<compile_context>
chip_gen: v7x
topology: tpu7x:2x2x1
jax: 0.10.0
libtpu: 0.0.40
codegen_flags: <defaults>
</compile_context>

<pallas_src>
import math

import jax
import jax.numpy as jnp
from jax import lax
from jax.experimental import pallas as pl
from jax.experimental.pallas import tpu as pltpu

EMBED_DIM = 32
NUM_HEADS = 4
HEAD_DIM = EMBED_DIM // NUM_HEADS


def _choose_batch_per_step(B, S, row_budget=256):
    """Pick CB = batch elements per grid step.

    * CB divides B; CB*S rows must be 8-aligned (f32 sublane tile) unless a
      single full-array step is used.
    * Keep >= 2 grid steps when B >= 2 so the "parallel" grid axis can shard
      across both v7x TensorCores (costs one ~0.35us extra step on single-TC
      v5e/v6e - negligible).
    * row_budget bounds CB*S: the packed score slab is (CB*S, H*CB*S) and the
      segment-ones matrix is (H*CB*S)^2 - quadratic in CB*S - so keep it to a
      few hundred rows.
      # TODO(synk): for long sequences switch to a flash-style key-block loop
      # instead of the packed (S, H*S) score slab.
    """
    if B == 1:
        return 1
    cap = max(1, min(B // 2, row_budget // max(S, 1)))
    for cb in range(cap, 0, -1):
        if B % cb == 0 and (cb * S) % 8 == 0:
            return cb
    return B  # single full-array step (block == full dims is always legal)


def multihead_attention(query, key, value, params, *, batch_per_step=None):
    """query/key/value: (B, S, E) f32. params: dict of (E,E) weights, (E,) biases."""
    B, S, E = query.shape
    assert E == EMBED_DIM
    H, Dh = NUM_HEADS, HEAD_DIM
    # Fused block-diagonal QKV projection is only worthwhile while 3E fits one
    # MXU pass; for production E revert to separate per-projection matmuls.
    assert 3 * E <= 128, "fused-QKV path gated to 3E <= 128 lanes"
    out_dtype = query.dtype
    scale = 1.0 / math.sqrt(Dh)

    if batch_per_step is None:
        batch_per_step = _choose_batch_per_step(B, S)
    CB = batch_per_step
    assert B % CB == 0, "batch_per_step must divide batch"
    G = B // CB        # grid steps ("parallel")
    R = CB * S         # query rows per grid step
    C = H * R          # packed (head, batch, key) columns per grid step

    # ---- host-side prep (weights, packing, masks): pure glue --------------
    # nn.Linear weights are (out, in); transpose to (in, out) so the kernel
    # computes x @ W + b.  Fold the 1/sqrt(Dh) softmax scale into the Q
    # projection (weight + bias).  Weights cast to bf16 (MXU native).
    wq = params["wq"].T * scale
    wk = params["wk"].T
    wv = params["wv"].T
    wo = params["wo"].T.astype(jnp.bfloat16)
    # Block-diagonal fused QKV weight: one (R, 3E) @ (3E, 3E) matmul yields
    # the [Q | K | V] slab even for distinct q/k/v inputs (cross-attention).
    wqkv = jnp.zeros((3 * E, 3 * E), jnp.float32)
    wqkv = wqkv.at[0:E, 0:E].set(wq)
    wqkv = wqkv.at[E:2 * E, E:2 * E].set(wk)
    wqkv = wqkv.at[2 * E:, 2 * E:].set(wv)
    wqkv = wqkv.astype(jnp.bfloat16)
    bqkv = jnp.concatenate([params["bq"] * scale, params["bk"], params["bv"]]
                           ).reshape(1, 3 * E).astype(jnp.float32)
    bo = params["bo"].reshape(1, E).astype(jnp.float32)

    # Pack [q | k | v] along lanes -> lane-dense (B*S, 3E) kernel input.
    # (Kept f32: the 8-row activation block is below bf16's 16-row tile; cast
    #  to bf16 happens in-kernel right before the MXU op.)
    qkv = jnp.concatenate([query.reshape(B * S, E),
                           key.reshape(B * S, E),
                           value.reshape(B * S, E)], axis=-1)

    # Tiny compile-time block masks, passed as inputs (resident in VMEM):
    #  * hmask  (C, E):  row-replica h of the tiled K/V slab keeps only head
    #                    h's Dh feature columns.
    #  * gseg   (C, C):  block-diagonal ones, group size S -> one matmul
    #                    computes+broadcasts every per-(head,batch) softmax sum.
    #  * sbias  (R, C):  0 / -1e30 additive mask killing cross-batch scores
    #                    (all zeros when CB == 1).
    rows_c = jnp.arange(C)[:, None]
    hmask = (rows_c // R == jnp.arange(E)[None, :] // Dh).astype(jnp.float32)
    gseg = (rows_c // S == jnp.arange(C)[None, :] // S).astype(jnp.bfloat16)
    rows_r = jnp.arange(R)[:, None]
    sbias = jnp.where(rows_r // S == (jnp.arange(C)[None, :] % R) // S,
                      0.0, -1e30).astype(jnp.float32)

    def kernel(qkv_ref, wqkv_ref, bqkv_ref, wo_ref, bo_ref,
               hmask_ref, gseg_ref, sbias_ref, o_ref):
        # (1) Fused Q/K/V projection: one bf16 MXU matmul, f32 accumulate.
        proj = jnp.dot(qkv_ref[...].astype(jnp.bfloat16), wqkv_ref[...],
                       preferred_element_type=jnp.float32) + bqkv_ref[...]   # (R, 3E)
        hm = hmask_ref[...]                                                  # (C, E)
        q_bf = proj[:, 0:E].astype(jnp.bfloat16)                             # (R, E)
        # Head-major tiled + block-masked K / V slabs: replica h keeps only
        # head h's feature columns.
        k_slab = (jnp.tile(proj[:, E:2 * E], (H, 1)) * hm).astype(jnp.bfloat16)  # (C, E)
        v_slab = (jnp.tile(proj[:, 2 * E:], (H, 1)) * hm).astype(jnp.bfloat16)   # (C, E)

        # (2) Scores for every (head, batch) group in ONE matmul:
        #     s[b*S+q, h*R + b'*S + k] = Q_{b,h}[q] . K_{b',h}[k]
        s = lax.dot_general(q_bf, k_slab, (((1,), (1,)), ((), ())),
                            preferred_element_type=jnp.float32)              # (R, C)
        s = s + sbias_ref[...]        # -1e30 on cross-batch columns (zeros if CB==1)

        # (3) Softmax per length-S key group.  One global row max is a valid
        #     shift for every group (numerator & denominator share it).
        m = jnp.max(s, axis=-1, keepdims=True)
        p = jnp.exp(s - m)
        # Per-group sums, broadcast back across the group, via one matmul
        # against the block-diagonal ones matrix.
        den = jnp.dot(p.astype(jnp.bfloat16), gseg_ref[...],
                      preferred_element_type=jnp.float32)                    # (R, C)
        # Exact divide for torch.softmax parity; +1e-30 only guards the
        # cross-batch columns (p == 0 there) against 0/0 when CB > 1.
        pn = (p / (den + 1e-30)).astype(jnp.bfloat16)

        # (4) Context for all heads in one matmul; head h's output lands
        #     directly in columns [h*Dh, (h+1)*Dh) -> already concat-head order.
        ctx = jnp.dot(pn, v_slab, preferred_element_type=jnp.float32)        # (R, E)

        # (5) Single output projection + bias; one full-block store.
        out = jnp.dot(ctx.astype(jnp.bfloat16), wo_ref[...],
                      preferred_element_type=jnp.float32) + bo_ref[...]
        o_ref[...] = out.astype(o_ref.dtype)

    out_flat = pl.pallas_call(
        kernel,
        out_shape=jax.ShapeDtypeStruct((B * S, E), out_dtype),
        grid=(G,),
        in_specs=[
            pl.BlockSpec((R, 3 * E), lambda g: (g, 0)),        # packed [q|k|v] rows
            pl.BlockSpec((3 * E, 3 * E), lambda g: (0, 0)),    # fused QKV weight (bf16)
            pl.BlockSpec((1, 3 * E), lambda g: (0, 0)),        # fused QKV bias (f32)
            pl.BlockSpec((E, E), lambda g: (0, 0)),            # Wo (in,out) bf16
            pl.BlockSpec((1, E), lambda g: (0, 0)),            # bo (f32)
            pl.BlockSpec((C, E), lambda g: (0, 0)),            # head block mask
            pl.BlockSpec((C, C), lambda g: (0, 0)),            # segment-ones (denoms)
            pl.BlockSpec((R, C), lambda g: (0, 0)),            # cross-batch score bias
        ],
        out_specs=pl.BlockSpec((R, E), lambda g: (g, 0)),
        compiler_params=pltpu.CompilerParams(
            dimension_semantics=("parallel",)),
    )(qkv, wqkv, bqkv, wo, bo, hmask, gseg, sbias)

    # (B*S, E) -> (B, S, E): pure reshape, no transpose / no extra HBM pass.
    return out_flat.reshape(B, S, E)


def init_params(key, embed_dim):
    """Deterministic nn.Linear-style init: U(-1/sqrt(fan_in), 1/sqrt(fan_in))."""
    bound = 1.0 / math.sqrt(embed_dim)
    keys = jax.random.split(key, 8)
    names_w = ["wq", "wk", "wv", "wo"]
    names_b = ["bq", "bk", "bv", "bo"]
    params = {}
    for i, n in enumerate(names_w):
        params[n] = jax.random.uniform(keys[i], (embed_dim, embed_dim),
                                       jnp.float32, -bound, bound)
    for i, n in enumerate(names_b):
        params[n] = jax.random.uniform(keys[4 + i], (embed_dim,),
                                       jnp.float32, -bound, bound)
    return params


def reference_mha(query, key, value, params):
    """Plain-JAX f32 reference mirroring the PyTorch forward exactly."""
    B, S, E = query.shape
    H, Dh = NUM_HEADS, HEAD_DIM
    Q = query @ params["wq"].T + params["bq"]
    K = key @ params["wk"].T + params["bk"]
    V = value @ params["wv"].T + params["bv"]
    Q = Q.reshape(B, S, H, Dh).transpose(0, 2, 1, 3)
    K = K.reshape(B, S, H, Dh).transpose(0, 2, 1, 3)
    V = V.reshape(B, S, H, Dh).transpose(0, 2, 1, 3)
    scores = jnp.einsum("bhqd,bhkd->bhqk", Q, K) / math.sqrt(Dh)
    A = jax.nn.softmax(scores, axis=-1)
    ctx = jnp.einsum("bhqk,bhkd->bhqd", A, V)
    ctx = ctx.transpose(0, 2, 1, 3).reshape(B, S, E)
    return ctx @ params["wo"].T + params["bo"]


if __name__ == "__main__":
    # TODO(synk): the module's pluggable `activation` callable and precision=8
    # (bitsandbytes int8 linears) are not implemented; softmax / f32-in path only.
    B, S, E = 2, 8, EMBED_DIM
    root = jax.random.PRNGKey(0)
    k_q, k_k, k_v, k_p = jax.random.split(root, 4)

    query = jax.random.normal(k_q, (B, S, E), jnp.float32)
    key_ = jax.random.normal(k_k, (B, S, E), jnp.float32)
    value = jax.random.normal(k_v, (B, S, E), jnp.float32)
    params = init_params(k_p, E)

    out = jax.block_until_ready(multihead_attention(query, key_, value, params))
    ref = reference_mha(query, key_, value, params)

    assert out.shape == (B, S, E)
    # bf16 MXU operands (per perf guidance) round at ~2^-8; the softmax uses
    # an exact divide, so 1e-2 abs/rel comfortably covers the bf16 noise.
    assert jnp.allclose(out, ref, atol=1e-2, rtol=1e-2), "mismatch vs reference"

    print("KERNEL_OK")
</pallas_src>

<mosaic_0001>
module attributes {stable_mosaic.version = 11 : i64} {
  func.func @kernel(%arg0: i32, %arg1: memref<8x96xf32, #tpu.memory_space<vmem>>, %arg2: memref<96x96xbf16, #tpu.memory_space<vmem>>, %arg3: memref<1x96xf32, #tpu.memory_space<vmem>>, %arg4: memref<32x32xbf16, #tpu.memory_space<vmem>>, %arg5: memref<1x32xf32, #tpu.memory_space<vmem>>, %arg6: memref<32x32xf32, #tpu.memory_space<vmem>>, %arg7: memref<32x32xbf16, #tpu.memory_space<vmem>>, %arg8: memref<8x32xf32, #tpu.memory_space<vmem>>, %arg9: memref<8x32xf32, #tpu.memory_space<vmem>>) attributes {dimension_semantics = [#tpu.dimension_semantics<parallel>], iteration_bounds = array<i64: 2>, scalar_prefetch = 0 : i64, scratch_operands = 0 : i64, tpu.core_type = #tpu.core_type<tc>, window_params = [{transform_indices = @transform_0, window_bounds = array<i64: 8, 96>}, {pipeline_mode = #tpu.pipeline_mode<synchronous>, transform_indices = @transform_1, window_bounds = array<i64: 96, 96>}, {pipeline_mode = #tpu.pipeline_mode<synchronous>, transform_indices = @transform_2, window_bounds = array<i64: 1, 96>}, {pipeline_mode = #tpu.pipeline_mode<synchronous>, transform_indices = @transform_3, window_bounds = array<i64: 32, 32>}, {pipeline_mode = #tpu.pipeline_mode<synchronous>, transform_indices = @transform_4, window_bounds = array<i64: 1, 32>}, {pipeline_mode = #tpu.pipeline_mode<synchronous>, transform_indices = @transform_5, window_bounds = array<i64: 32, 32>}, {pipeline_mode = #tpu.pipeline_mode<synchronous>, transform_indices = @transform_6, window_bounds = array<i64: 32, 32>}, {pipeline_mode = #tpu.pipeline_mode<synchronous>, transform_indices = @transform_7, window_bounds = array<i64: 8, 32>}, {transform_indices = @transform_8, window_bounds = array<i64: 8, 32>}]} {
    %c0 = arith.constant 0 : index
    %c0_0 = arith.constant 0 : index
    %0 = vector.load %arg1[%c0, %c0_0] : memref<8x96xf32, #tpu.memory_space<vmem>>, vector<8x96xf32>
    %1 = arith.truncf %0 : vector<8x96xf32> to vector<8x96xbf16>
    %c0_1 = arith.constant 0 : index
    %c0_2 = arith.constant 0 : index
    %2 = vector.load %arg2[%c0_1, %c0_2] : memref<96x96xbf16, #tpu.memory_space<vmem>>, vector<96x96xbf16>
    %cst = arith.constant dense<0.000000e+00> : vector<8x96xf32>
    %3 = tpu.matmul %1, %2, %cst {dimension_numbers = #tpu.dot_dimension_numbers<[1], [0], [0], [1], [0, 0, 1, 1], [], []>} : vector<8x96xbf16>, vector<96x96xbf16>, vector<8x96xf32> -> vector<8x96xf32>
    %c0_3 = arith.constant 0 : index
    %c0_4 = arith.constant 0 : index
    %4 = vector.load %arg3[%c0_3, %c0_4] : memref<1x96xf32, #tpu.memory_space<vmem>>, vector<1x96xf32>
    %5 = vector.broadcast %4 : vector<1x96xf32> to vector<8x96xf32>
    %6 = arith.addf %3, %5 : vector<8x96xf32>
    %c0_5 = arith.constant 0 : index
    %c0_6 = arith.constant 0 : index
    %7 = vector.load %arg6[%c0_5, %c0_6] : memref<32x32xf32, #tpu.memory_space<vmem>>, vector<32x32xf32>
    %8 = vector.extract_strided_slice %6 {offsets = [0, 0], sizes = [8, 32], strides = [1, 1]} : vector<8x96xf32> to vector<8x32xf32>
    %9 = arith.truncf %8 : vector<8x32xf32> to vector<8x32xbf16>
    %10 = vector.extract_strided_slice %6 {offsets = [0, 32], sizes = [8, 32], strides = [1, 1]} : vector<8x96xf32> to vector<8x32xf32>
    %11 = tpu.concatenate %10, %10, %10, %10 in 0 : vector<8x32xf32>, vector<8x32xf32>, vector<8x32xf32>, vector<8x32xf32> -> vector<32x32xf32>
    %12 = arith.mulf %11, %7 : vector<32x32xf32>
    %13 = arith.truncf %12 : vector<32x32xf32> to vector<32x32xbf16>
    %14 = vector.extract_strided_slice %6 {offsets = [0, 64], sizes = [8, 32], strides = [1, 1]} : vector<8x96xf32> to vector<8x32xf32>
    %15 = tpu.concatenate %14, %14, %14, %14 in 0 : vector<8x32xf32>, vector<8x32xf32>, vector<8x32xf32>, vector<8x32xf32> -> vector<32x32xf32>
    %16 = arith.mulf %15, %7 : vector<32x32xf32>
    %17 = arith.truncf %16 : vector<32x32xf32> to vector<32x32xbf16>
    %cst_7 = arith.constant dense<0.000000e+00> : vector<8x32xf32>
    %18 = tpu.matmul %9, %13, %cst_7 {dimension_numbers = #tpu.dot_dimension_numbers<[1], [1], [0], [0], [0, 0, 1, 0], [], []>} : vector<8x32xbf16>, vector<32x32xbf16>, vector<8x32xf32> -> vector<8x32xf32>
    %c0_8 = arith.constant 0 : index
    %c0_9 = arith.constant 0 : index
    %19 = vector.load %arg8[%c0_8, %c0_9] : memref<8x32xf32, #tpu.memory_space<vmem>>, vector<8x32xf32>
    %20 = arith.addf %18, %19 : vector<8x32xf32>
    %cst_10 = arith.constant dense<0xFF800000> : vector<8xf32>
    %21 = vector.multi_reduction <maximumf>, %20, %cst_10 [1] : vector<8x32xf32> to vector<8xf32>
    %22 = vector.shape_cast %21 : vector<8xf32> to vector<8x1xf32>
    %23 = vector.broadcast %22 : vector<8x1xf32> to vector<8x32xf32>
    %24 = arith.subf %20, %23 : vector<8x32xf32>
    %25 = math.exp %24 : vector<8x32xf32>
    %26 = arith.truncf %25 : vector<8x32xf32> to vector<8x32xbf16>
    %c0_11 = arith.constant 0 : index
    %c0_12 = arith.constant 0 : index
    %27 = vector.load %arg7[%c0_11, %c0_12] : memref<32x32xbf16, #tpu.memory_space<vmem>>, vector<32x32xbf16>
    %cst_13 = arith.constant dense<0.000000e+00> : vector<8x32xf32>
    %28 = tpu.matmul %26, %27, %cst_13 {dimension_numbers = #tpu.dot_dimension_numbers<[1], [0], [0], [1], [0, 0, 1, 1], [], []>} : vector<8x32xbf16>, vector<32x32xbf16>, vector<8x32xf32> -> vector<8x32xf32>
    %cst_14 = arith.constant 1.000000e-30 : f32
    %29 = vector.broadcast %cst_14 : f32 to vector<8x32xf32>
    %30 = arith.addf %28, %29 : vector<8x32xf32>
    %31 = arith.divf %25, %30 : vector<8x32xf32>
    %32 = arith.truncf %31 : vector<8x32xf32> to vector<8x32xbf16>
    %cst_15 = arith.constant dense<0.000000e+00> : vector<8x32xf32>
    %33 = tpu.matmul %32, %17, %cst_15 {dimension_numbers = #tpu.dot_dimension_numbers<[1], [0], [0], [1], [0, 0, 1, 1], [], []>} : vector<8x32xbf16>, vector<32x32xbf16>, vector<8x32xf32> -> vector<8x32xf32>
    %34 = arith.truncf %33 : vector<8x32xf32> to vector<8x32xbf16>
    %c0_16 = arith.constant 0 : index
    %c0_17 = arith.constant 0 : index
    %35 = vector.load %arg4[%c0_16, %c0_17] : memref<32x32xbf16, #tpu.memory_space<vmem>>, vector<32x32xbf16>
    %cst_18 = arith.constant dense<0.000000e+00> : vector<8x32xf32>
    %36 = tpu.matmul %34, %35, %cst_18 {dimension_numbers = #tpu.dot_dimension_numbers<[1], [0], [0], [1], [0, 0, 1, 1], [], []>} : vector<8x32xbf16>, vector<32x32xbf16>, vector<8x32xf32> -> vector<8x32xf32>
    %c0_19 = arith.constant 0 : index
    %c0_20 = arith.constant 0 : index
    %37 = vector.load %arg5[%c0_19, %c0_20] : memref<1x32xf32, #tpu.memory_space<vmem>>, vector<1x32xf32>
    %38 = vector.broadcast %37 : vector<1x32xf32> to vector<8x32xf32>
    %39 = arith.addf %36, %38 : vector<8x32xf32>
    %c0_21 = arith.constant 0 : index
    %c0_22 = arith.constant 0 : index
    %40 = vector.load %arg9[%c0_21, %c0_22] : memref<8x32xf32, #tpu.memory_space<vmem>>, vector<8x32xf32>
    tpu.vector_store %arg9[%c0_21, %c0_22], %39 {strides = array<i32>} : memref<8x32xf32, #tpu.memory_space<vmem>>, vector<8x32xf32>,
    return
  }
  func.func @transform_0(%arg0: i32) -> (i32, i32) {
    %c0_i32 = arith.constant 0 : i32
    %c0_i32_0 = arith.constant 0 : i32
    return %arg0, %c0_i32 : i32, i32
  }
  func.func @transform_1(%arg0: i32) -> (i32, i32) {
    %c0_i32 = arith.constant 0 : i32
    %c0_i32_0 = arith.constant 0 : i32
    %c0_i32_1 = arith.constant 0 : i32
    return %c0_i32, %c0_i32_0 : i32, i32
  }
  func.func @transform_2(%arg0: i32) -> (i32, i32) {
    %c0_i32 = arith.constant 0 : i32
    %c0_i32_0 = arith.constant 0 : i32
    %c0_i32_1 = arith.constant 0 : i32
    return %c0_i32, %c0_i32_0 : i32, i32
  }
  func.func @transform_3(%arg0: i32) -> (i32, i32) {
    %c0_i32 = arith.constant 0 : i32
    %c0_i32_0 = arith.constant 0 : i32
    %c0_i32_1 = arith.constant 0 : i32
    return %c0_i32, %c0_i32_0 : i32, i32
  }
  func.func @transform_4(%arg0: i32) -> (i32, i32) {
    %c0_i32 = arith.constant 0 : i32
    %c0_i32_0 = arith.constant 0 : i32
    %c0_i32_1 = arith.constant 0 : i32
    return %c0_i32, %c0_i32_0 : i32, i32
  }
  func.func @transform_5(%arg0: i32) -> (i32, i32) {
    %c0_i32 = arith.constant 0 : i32
    %c0_i32_0 = arith.constant 0 : i32
    %c0_i32_1 = arith.constant 0 : i32
    return %c0_i32, %c0_i32_0 : i32, i32
  }
  func.func @transform_6(%arg0: i32) -> (i32, i32) {
    %c0_i32 = arith.constant 0 : i32
    %c0_i32_0 = arith.constant 0 : i32
    %c0_i32_1 = arith.constant 0 : i32
    return %c0_i32, %c0_i32_0 : i32, i32
  }
  func.func @transform_7(%arg0: i32) -> (i32, i32) {
    %c0_i32 = arith.constant 0 : i32
    %c0_i32_0 = arith.constant 0 : i32
    %c0_i32_1 = arith.constant 0 : i32
    return %c0_i32, %c0_i32_0 : i32, i32
  }
  func.func @transform_8(%arg0: i32) -> (i32, i32) {
    %c0_i32 = arith.constant 0 : i32
    %c0_i32_0 = arith.constant 0 : i32
    return %arg0, %c0_i32 : i32, i32
  }
}

</mosaic_0001>

<bundles_post_ra>
// kernel: tpu_custom_call.1
= control target key start
LH: loop header
LB: loop body
LE: loop exit
PB: predicated region body
PF: predicated region fallthrough
CT: control target
= control target key end

     0   :  { %13 = vsyncpa [#allocation3], 0  ;;  %s1629_s0 = inlined_call_operand.hbm [shape: f32[16,96], index: 0, kind: input, shape index: {}]   ;;  %s1630_s1 = inlined_call_operand.hbm [shape: bf16[96,96], index: 1, kind: input, shape index: {}]   ;;  %s1631_s2 = inlined_call_operand.vmem [shape: f32[1,96], index: 2, kind: input, shape index: {}]   ;;  %s1632_s3 = inlined_call_operand.hbm [shape: bf16[32,32], index: 3, kind: input, shape index: {}]   ;;  %s1633_s4 = inlined_call_operand.vmem [shape: f32[1,32], index: 4, kind: input, shape index: {}]   ;;  %s1634_s5 = inlined_call_operand.hbm [shape: f32[32,32], index: 5, kind: input, shape index: {}]   ;;  %s1635_s6 = inlined_call_operand.vmem [shape: bf16[32,32], index: 6, kind: input, shape index: {}]   ;;  %s1636_s7 = inlined_call_operand.vmem [shape: f32[8,32], index: 7, kind: input, shape index: {}]   ;;  %s1637_s8 = inlined_call_operand.hbm [shape: f32[16,32], index: 8, kind: output, shape index: {}]  }
   0x1   :  { %15 = vsyncpa [#allocation3 + $0x1], 0 }
   0x2   :  { %16 = vsyncpa [#allocation6], 0 }
   0x3   :  { %17 = vsyncpa [#allocation9], 0 }
   0x4   :  { %18 = vsyncpa [#allocation4], 0 }
   0x5   :  { %20 = vsyncpa [#allocation4 + $0x1], 0  ;;  %s1321_s27 = smov 0   ;;  %s1323_s28 = smov 0  }
   0x6   :  { %s1325_s29 = smov 0   ;;  %s1327_s30 = smov 0  }
   0x7 LB: > { %1643 = sst [smem:[#allocation15_spill]] %s1248_s27  ;;  %s1342_s9 = sadd.s32 4294967295, %s1260_s30   ;;  %s1260_s30 = sphi %s1327_s30, %s1667_s30   ;;  %s1256_s29 = sphi %s1325_s29, %s1666_s29   ;;  %s1252_s28 = sphi %s1323_s28, %s1665_s28   ;;  %s1248_s27 = sphi %s1321_s27, %s1664_s27  }
   0x8   : > { %s870_s10 = sadd.s32 4294967294, %s1260_s30   ;;  %p46_p0 = scmp.ne.s32.totalorder %s1252_s28, %s1248_s27 }
   0x9   : > { %p1638_p1 = scmp.eq.s32.totalorder %s1342_s9, 0  ;;  %p223_p3 = scmp.eq.s32.totalorder %s870_s10, 1 }
   0xa   : > { %p871_p5 = scmp.ge.s32.totalorder %s1260_s30, 1  ;;  %p230_p7 = scmp.lt.s32.totalorder %s1260_s30, 3 }
   0xb   : > { %p1351_p4 = por %p1638_p1, %p46_p0  ;;  %p1356_p6 = por %p223_p3, %p46_p0 }
   0xc   : > { %p1361_p8 = pnand %p871_p5, %p230_p7  ;;  %s1262_s14 = smov [#allocation5]  }
   0xd   : > { %s1644_s11 = scalar_select %p1351_p4, 1, 0 }
   0xe   : > { %s1645_s12 = scalar_select %p1356_p6, 1, 0 }
   0xf   : > { %s1647_s13 = scalar_select %p1361_p8, 1, 0 }
  0x10   : > { %1646 = sst [smem:[#allocation16_spill]] %s1645_s12  ;;  %s242_s15 = sshll.u32 %s1262_s14, 4  ;;  %s1365_s15 = int_to_ptr.vmem [resolvable:$true] %s242_s15 }
  0x11   : > { %p988_p9 = pneg %p1361_p8  ;;  %s1263_s17 = smov [#allocation7]  }
  0x12   : > { %s258_s18 = sshll.u32 %s1263_s17, 4  ;;  %s1264_s19 = smov [#allocation8]   ;;  %s1376_s18 = int_to_ptr.vmem [resolvable:$true] %s258_s18 }
  0x13   : > { %p1372_p11 = pnand %p988_p9, %p1638_p1  ;;  %s1378_s20 = sshll.u32 %s1264_s19, 4  ;;  %s275_s20 = int_to_ptr.vmem [resolvable:$true] %s1378_s20 }
  0x14   : > { %s1072_s23 = scalar_lea.hbm %s1630_s1, 768 }
  0x15   : > { %p1073_p12 = scmp.ne.s32.totalorder %s1630_s1, %s1072_s23  ;;  %p1388_p13 = pneg %p1372_p11 }
  0x16   : > { %p1079_p5 = scmp.lt.u32.totalorder %s1072_s23, %s1630_s1 }
  0x17   : > { %p1075_p0 = pnand %p1388_p13, %p1073_p12 }
  0x19   : > { %p1076_p3 = pneg %p1075_p0 }
  0x1b   : > { %p1081_p7 = pnand %p1079_p5, %p1076_p3 }
  0x1d   : > { %1084 = shalt.err (!%p1081_p7)
}
  0x1e   : > { %s1085_s17 = scalar_lea.vmem %s1365_s15, 768  ;;  %p1093_p2 = scmp.lt.s32.totalorder %s1365_s15, %s1365_s15 }
  0x1f   : > { %p1086_p9 = scmp.ne.s32.totalorder %s1365_s15, %s1085_s17  ;;  %p1094_p6 = scmp.lt.s32.totalorder %s1085_s17, %s1085_s17 }
  0x21   : > { %p1088_p10 = pnand %p1086_p9, %p1388_p13  ;;  %p1095_p12 = por %p1094_p6, %p1093_p2 }
  0x23   : > { %p1089_p1 = pneg %p1088_p10 }
  0x25   : > { %p1096_p0 = pnand %p1095_p12, %p1089_p1 }
  0x27   : > { %1099 = shalt.err (!%p1096_p0)
}
  0x28   : > { %s1265_s19 = smov 64   ;;  %s1266_s21 = smov 4  }
  0x29   : > { %991 = dma.hbm_to_vmem [thread:$0]  (!%p1372_p11), %s1630_s1, 768, %s1365_s15, [#allocation6], %s1265_s19, %s1265_s19, %s1266_s21  }
  0x2a   : > { %s1100_s10 = scalar_lea.hbm %s1632_s3, 256 }
  0x2b   : > { %p1101_p2 = scmp.ne.s32.totalorder %s1632_s3, %s1100_s10  ;;  %p1107_p10 = scmp.lt.u32.totalorder %s1100_s10, %s1632_s3 }
  0x2d   : > { %p1103_p1 = pnand %p1101_p2, %p1388_p13 }
  0x2f   : > { %p1104_p6 = pneg %p1103_p1 }
  0x31   : > { %p1109_p3 = pnand %p1107_p10, %p1104_p6 }
  0x33   : > { %1112 = shalt.err (!%p1109_p3)
}
  0x34   : > { %s1113_s15 = scalar_lea.vmem %s1376_s18, 256  ;;  %p1121_p12 = scmp.lt.s32.totalorder %s1376_s18, %s1376_s18 }
  0x35   : > { %p1114_p5 = scmp.ne.s32.totalorder %s1376_s18, %s1113_s15  ;;  %p1122_p0 = scmp.lt.s32.totalorder %s1113_s15, %s1113_s15 }
  0x37   : > { %p1116_p7 = pnand %p1114_p5, %p1388_p13  ;;  %p1123_p2 = por %p1122_p0, %p1121_p12 }
  0x39   : > { %p1117_p9 = pneg %p1116_p7 }
  0x3b   : > { %p1124_p1 = pnand %p1123_p2, %p1117_p9 }
  0x3d   : > { %1127 = shalt.err (!%p1124_p1)
}
  0x3e   : > { %994 = dma.hbm_to_vmem [thread:$0]  (!%p1372_p11), %s1632_s3, 256, %s1376_s18, [#allocation6], %s1265_s19, %s1265_s19, %s1266_s21  }
  0x3f   : > { %s1128_s24 = scalar_lea.hbm %s1634_s5, 512 }
  0x40   : > { %p1129_p6 = scmp.ne.s32.totalorder %s1634_s5, %s1128_s24  ;;  %p1135_p5 = scmp.lt.u32.totalorder %s1128_s24, %s1634_s5 }
  0x42   : > { %p1131_p10 = pnand %p1129_p6, %p1388_p13 }
  0x44   : > { %p1132_p3 = pneg %p1131_p10 }
  0x46   : > { %p1137_p7 = pnand %p1135_p5, %p1132_p3 }
  0x48   : > { %1140 = shalt.err (!%p1137_p7)
}
  0x49   : > { %s1141_s15 = scalar_lea.vmem %s275_s20, 512  ;;  %p1149_p2 = scmp.lt.s32.totalorder %s275_s20, %s275_s20 }
  0x4a   : > { %p1142_p9 = scmp.ne.s32.totalorder %s275_s20, %s1141_s15  ;;  %p1150_p1 = scmp.lt.s32.totalorder %s1141_s15, %s1141_s15 }
  0x4c   : > { %p1144_p12 = pnand %p1142_p9, %p1388_p13  ;;  %p1151_p4 = por %p1150_p1, %p1149_p2 }
  0x4e   : > { %p1145_p0 = pneg %p1144_p12 }
  0x50   : > { %p1152_p8 = pnand %p1151_p4, %p1145_p0 }
  0x52   : > { %1155 = shalt.err (!%p1152_p8)
}
  0x53   : > { %s1267_s18 = smov 128   ;;  %s1268_s26 = smov 8  }
  0x54   : > { %997 = dma.hbm_to_vmem [thread:$0]  (!%p1372_p11), %s1634_s5, 512, %s275_s20, [#allocation9], %s1267_s18, %s1267_s18, %s1268_s26  }
  0x55   : > { %s1452_s27 = sadd.s32 1, %s1260_s30   ;;  %s33_s22 = sadd.s32 1, %s1256_s29 }
  0x56   : > { %s30_s12 = ssub.s32 %s1260_s30, %s1452_s27  ;;  %p40_p8 = scmp.ne.s32.totalorder %s1256_s29, %s1252_s28 }
  0x57   : > { %p31_p4 = scmp.eq.s32.totalorder %s30_s12, 0  ;;  %p41_p13 = scmp.eq.s32.totalorder %s1260_s30, 0 }
  0x58   : > { %p1009_p6 = scmp.lt.s32.totalorder %s1260_s30, 2  ;;  %p1650_p3 = scmp.eq.s32.totalorder %s1342_s9, 1 }
  0x59   : > { %s1462_s23 = scalar_select %p31_p4, %s1256_s29, %s33_s22  }
  0x5a   : > { %p42_p10 = por %p41_p13, %p40_p8  ;;  %p1466_p5 = por %p1650_p3, %p40_p8 }
  0x5b   : > { %s294_s16 = sand.u32 1, %s1256_s29   ;;  %s877_s25 = sshll.u32 %s1260_s30, 7 }
  0x5c   : > { %s876_s20 = sshll.u32 %s294_s16, 3  ;;  %s1475_s17 = scalar_lea.hbm %s1629_s0, %s877_s25 }
  0x5d   : > { %s298_s15 = scalar_lea.vmem [#allocation2], %s876_s20  ;;  %p1477_p11 = pnand %p1009_p6, %p42_p10 }
  0x5e   : > { %s305_s18 = sshll.u32 %s298_s15, 4  ;;  %s295_s19 = scalar_lea.sflag [#allocation3], %s294_s16  ;;  %s1481_s18 = int_to_ptr.vmem [resolvable:$true] %s305_s18 }
  0x5f   : > { %s1156_s21 = scalar_lea.hbm %s1475_s17, 128  ;;  %p1158_p9 = pneg %p1477_p11 }
  0x60   : > { %p1157_p7 = scmp.ne.s32.totalorder %s1475_s17, %s1156_s21  ;;  %s1161_s25 = scalar_lea.hbm %s1629_s0, 256 }
  0x61   : > { %p1162_p2 = scmp.lt.u32.totalorder %s1475_s17, %s1629_s0  ;;  %p1163_p1 = scmp.lt.u32.totalorder %s1161_s25, %s1156_s21 }
  0x62   : > { %p1159_p12 = pnand %p1158_p9, %p1157_p7  ;;  %p1165_p8 = scmp.lt.u32.totalorder %s1156_s21, %s1475_s17 }
  0x63   : > { %p1164_p4 = por %p1163_p1, %p1162_p2 }
  0x64   : > { %p1160_p0 = pneg %p1159_p12 }
  0x65   : > { %p1166_p13 = por %p1165_p8, %p1164_p4 }
  0x67   : > { %p1167_p6 = pnand %p1166_p13, %p1160_p0 }
  0x69   : > { %1170 = shalt.err (!%p1167_p6)
}
  0x6a   : > { %s1171_s16 = scalar_lea.vmem %s1481_s18, 128  ;;  %s1269_s14 = smov [#allocation2]  }
  0x6b   : > { %p1172_p10 = scmp.ne.s32.totalorder %s1481_s18, %s1171_s16  ;;  %s1176_s15 = sshll.u32 %s1269_s14, 4  ;;  %s1177_s15 = int_to_ptr.vmem [resolvable:$false] %s1176_s15 }
  0x6c   : > { %s1178_s12 = scalar_lea.vmem %s1177_s15, 256  ;;  %p1179_p12 = scmp.lt.s32.totalorder %s1481_s18, %s1177_s15 }
  0x6d   : > { %p1174_p3 = pnand %p1172_p10, %p1158_p9  ;;  %p1180_p2 = scmp.lt.s32.totalorder %s1178_s12, %s1171_s16 }
  0x6f   : > { %p1175_p7 = pneg %p1174_p3  ;;  %p1181_p1 = por %p1180_p2, %p1179_p12 }
  0x71   : > { %p1182_p4 = pnand %p1181_p1, %p1175_p7 }
  0x73   : > { %1185 = shalt.err (!%p1182_p4)
}
  0x74   : > { %1001 = dma.hbm_to_vmem [thread:$0]  (!%p1477_p11), %s1475_s17, 128, %s1481_s18, %s295_s19  }
  0x75   : > { %p1653_p0 = scmp.ne.s32.totalorder %s1647_s13, 0 }
  0x76   : > { %s1511_s21 = sand.u32 (!%p1653_p0), 1, %s1252_s28   ;;  %p1654_p9 = scmp.ne.s32.totalorder (!%p1653_p0), %s1644_s11, 0 }
  0x77   : > { %314 = sbr.rel (%p1653_p0) target bundleno = 1554 (0x612), region = 52  ;;  %s879_s22 = sshll.u32 (!%p1653_p0), %s1511_s21, 3 }
  0x78   : > { %s317_s25 = scalar_lea.sflag (!%p1653_p0), [#allocation3], %s1511_s21  ;;  %s1517_s20 = scalar_lea.vmem (!%p1653_p0), [#allocation2], %s879_s22 }
  0x7e   : > { %1231 = dma.done.wait (%p1654_p9), %s317_s25, 128  }
  0x7f   : > { %1233 = vsyncadd (%p1654_p9), %s317_s25, 4294967168  ;;  %p1655_p11 = scmp.eq.s32.totalorder %s1342_s9, 0 }
  0x81   : > { %1235 = dma.done.wait (%p1655_p11), [#allocation6], 1024   ;;  %p1656_p8 = pmov %p1655_p11 }
  0x83   : > { %1237 = vsyncadd (%p1656_p8), [#allocation6], 4294966272  ;;  %p1657_p13 = pmov %p1656_p8 }
  0x84   : > { %p1658_p6 = pmov %p1656_p8 }
  0x85   : > { %1239 = dma.done.wait (%p1657_p13), [#allocation9], 512  }
  0x86   : > { %1241 = vsyncadd (%p1658_p6), [#allocation9], 4294966784  ;;  %v1270_v0 = vmov 0.0   ;;  %vm1271_vm0 = vmmov 0   ;;  %v1058_v1 = vld [vmem:[#allocation5] sm:$0xff]   ;;  %v1059_v2 = vld [vmem:[#allocation5 + $0x8] sm:$0xff]  }
  0x87   : > { %924 = vmatprep.subr.bf16.mxu0 %v1270_v0  ;;  %936 = vmatprep.mubr.msk.bf16.mxu0 %vm1271_vm0, %v1270_v0  ;;  %v1060_v3 = vld [vmem:[#allocation5 + $0x10] sm:$0xff]   ;;  %v467_v5 = vld [vmem:[#allocation8] sm:$0xff]  ;;  %s1272_s11 = smov 32   ;;  %v470_v6 = vld [vmem:[#allocation8 + $0x18] sm:$0xff]  ;;  %vm423_vm1 = vcmask 785408   ;;  %s1273_s18 = smov 96  }
  0x88   : > { %940 = vmatprep.subr.bf16.mxu1 %v1270_v0  ;;  %944 = vmatprep.mubr.msk.bf16.mxu1 %vm1271_vm0, %v1270_v0  ;;  %v469_v4 = vld [vmem:[#allocation8 + $0x10] sm:$0xff]  ;;  %v468_v7 = vld [vmem:[#allocation8 + $0x8] sm:$0xff]  ;;  %v1061_v8 = vld [vmem:[#allocation5 + $0x18] sm:$0xff]   ;;  %s1274_s26 = smov 64   ;;  %vm519_vm2 = vcmask 261120   ;;  %s364_s13 = scalar_lea.vmem [#allocation10], %s879_s22 }
  0x89   : > { %925 = vmatpush3.bf16.msra.mxu0 %v1058_v1  ;;  %480 = vrot.lane.b32.xlu1 %v469_v4, %s1272_s11  ;;  %v1062_v9 = vld [vmem:[#allocation5 + $0x20] sm:$0xff]   ;;  %v1063_v10 = vld [vmem:[#allocation5 + $0x28] sm:$0xff]   ;;  %v366_v11 = vld [vmem:[%s1517_s20] sm:$0xff]  ;;  %s771_s17 = sshll.u32 %s364_s13, 4  ;;  %s1275_s10 = smov [#allocation10]   ;;  %s1586_s17 = int_to_ptr.vmem [resolvable:$true] %s771_s17 }
  0x8a   : > { %926 = vmatprep.subr.bf16.mxu0 %v1270_v0  ;;  %476 = vrot.lane.b32.xlu0 %v467_v5, %s1272_s11  ;;  %v367_v12 = vpack.c.bf16 %v366_v11, %v366_v11  ;;  %v884_v15 = vld [vmem:[%s1631_s2] ss:$0 sm:$0xff]  ;;  %v1065_v54 = vld [vmem:[%s1635_s6 + $0x8] sm:$0xff]   ;;  %s1186_s22 = scalar_lea.vmem %s1586_s17, 128  ;;  %s1190_s16 = sshll.u32 %s1275_s10, 4  ;;  %s1191_s16 = int_to_ptr.vmem [resolvable:$false] %s1190_s16 }
  0x8b   : > { %v512_v46 = vld [vmem:[%s1636_s7] sm:$0xff]  ;;  %v1067_v61 = vld [vmem:[#allocation7 + $0x8] sm:$0xff]   ;;  %p1187_p10 = scmp.ne.s32.totalorder %s1586_s17, %s1186_s22  ;;  %s1192_s14 = scalar_lea.vmem %s1191_s16, 256 }
  0x8c   : > { %v1064_v53 = vld [vmem:[%s1635_s6] sm:$0xff]   ;;  %p1193_p12 = scmp.lt.s32.totalorder %s1586_s17, %s1191_s16  ;;  %p1194_p2 = scmp.lt.s32.totalorder %s1192_s14, %s1186_s22 }
  0x8d   : > { %927 = vmatpush3.bf16.msra.mxu0 %v1059_v2  ;;  %482 = vrot.lane.b32.xlu1 %v470_v6, %s1272_s11  ;;  %v1066_v60 = vld [vmem:[#allocation7] sm:$0xff]   ;;  %p1188_p3 = pnand %p1187_p10, %p1466_p5 }
  0x8e   : > { %928 = vmatprep.subr.bf16.mxu0 %v1270_v0  ;;  %478 = vrot.lane.b32.xlu0 %v468_v7, %s1272_s11  ;;  %v897_v11 = vld [vmem:[%s1633_s4] ss:$0 sm:$0xff]  ;;  %s902_s11 = sshll.u32 %s1342_s9, 7  ;;  %s758_s9 = scalar_lea.sflag [#allocation4], %s1511_s21 }
  0x8f   : > { %s1584_s19 = scalar_lea.hbm %s1637_s8, %s902_s11  ;;  %p1189_p7 = pneg %p1188_p3 }
  0x90   : > { %p1195_p1 = por %p1194_p2, %p1193_p12 }
  0x91   : > { %929 = vmatpush3.bf16.msra.mxu0 %v1060_v3 }
  0x92   : > { %930 = vmatprep.subr.bf16.mxu0 %v1270_v0  ;;  %p1196_p4 = pnand %p1195_p1, %p1189_p7 }
  0x95   : > { %931 = vmatpush3.bf16.msra.mxu0 %v1061_v8 }
  0x96   : > { %932 = vmatprep.subr.bf16.mxu0 %v1270_v0 }
  0x99   : > { %933 = vmatpush3.bf16.msra.mxu0 %v1062_v9 }
  0x9a   : > { %934 = vmatprep.subr.bf16.mxu0 %v1270_v0 }
  0x9d   : > { %935 = vmatpush3.bf16.msra.mxu0 %v1063_v10 }
  0x9e   : > { %956 = vmatprep.subr.bf16.mxu0 %v1270_v0 }
  0xa0   : > { %937 = vmatmul.mubr.msk.bf16.vlgmr.msra.gmra.mrb[0].mxu0 %vm423_vm1, %v367_v12 }
  0xa1   : > { %960 = vmatprep.mubr.msk.bf16.mxu0 %vm1271_vm0, %v1270_v0 }
  0xfb   : > { %v481_v13 = vpop.permute.xlu1 %480 }
  0xfc   : > { %v477_v14 = vpop.permute.xlu0 %476 }
  0xff   : > { %v483_v16 = vpop.permute.xlu1 %482 }
 0x100   : > { %v479_v18 = vpop.permute.xlu0 %478 }
 0x173   : > { %v461_v17 = vpop.f32.mrb[0].mxu0 }
 0x174   : > { %v462_v19 = vadd.f32 %v884_v15, %v461_v17  ;;  %v938_v20 = vpop.f32.mrb[1].mxu0 }
 0x175   : > { %v464_v21 = vpop.f32.mrb[2].mxu0 }
 0x176   : > { %v490_v22 = vmul.f32 %v481_v13, %v462_v19  ;;  %v491_v23 = vmul.f32 %v483_v16, %v462_v19  ;;  %v488_v24 = vmul.f32 %v477_v14, %v462_v19  ;;  %v489_v25 = vmul.f32 %v479_v18, %v462_v19  ;;  %v939_v26 = vpop.f32.mrb[3].mxu0 }
 0x177   : > { %v471_v39 = vpack.c.bf16 %v462_v19, %v462_v19 }
 0x178   : > { %v493_v27 = vpack.c.bf16 %v491_v23, %v490_v22  ;;  %v492_v28 = vpack.c.bf16 %v489_v25, %v488_v24 }
 0x17a   : > { %517 = vrot.lane.b32.xlu1 %v493_v27, %s1273_s18  ;;  %515 = vrot.lane.b32.xlu0 %v492_v28, %s1273_s18 }
 0x17e   : > { %494 = vrot.lane.b32.xlu1 %v467_v5, %s1274_s26 }
 0x182   : > { %496 = vrot.lane.b32.xlu1 %v468_v7, %s1274_s26 }
 0x186   : > { %498 = vrot.lane.b32.xlu1 %v469_v4, %s1274_s26 }
 0x18a   : > { %500 = vrot.lane.b32.xlu1 %v470_v6, %s1274_s26 }
 0x1ec   : > { %v518_v29 = vpop.permute.xlu1 %517  ;;  %v516_v30 = vpop.permute.xlu0 %515 }
 0x1ed   : > { %v524_v31 = vsel %vm519_vm2, %v516_v30, 0  ;;  %v527_v34 = vsel %vm519_vm2, %v518_v29, 0 }
 0x1ee   : > { %941 = vmatpush3.bf16.xpose.msra.mxu1 %v524_v31 }
 0x1ef   : > { %942 = vmatprep.subr.bf16.mxu1 %v1270_v0 }
 0x1f0   : > { %v495_v32 = vpop.permute.xlu1 %494 }
 0x1f1   : > { %v506_v35 = vmul.f32 %v495_v32, %v462_v19 }
 0x1f4   : > { %v497_v33 = vpop.permute.xlu1 %496 }
 0x1f5   : > { %v507_v36 = vmul.f32 %v497_v33, %v462_v19 }
 0x1f6   : > { %943 = vmatpush3.bf16.xpose.msra.mxu1 %v527_v34 }
 0x1f7   : > { %v510_v37 = vpack.c.bf16 %v507_v36, %v506_v35  ;;  %948 = vmatprep.subr.bf16.mxu1 %v1270_v0 }
 0x1f8   : > { %v499_v38 = vpop.permute.xlu1 %498 }
 0x1f9   : > { %640 = vrot.lane.b32.xlu1 %v510_v37, %s1274_s26  ;;  %v508_v41 = vmul.f32 %v499_v38, %v462_v19 }
 0x1fc   : > { %v501_v40 = vpop.permute.xlu1 %500 }
 0x1fd   : > { %v509_v42 = vmul.f32 %v501_v40, %v462_v19  ;;  %945 = vmatmul.mubr.msk.bf16.vlgmr.msra.gmra.mrb[0].mxu1 %vm519_vm2, %v471_v39 }
 0x1fe   : > { %952 = vmatprep.mubr.msk.bf16.mxu1 %vm1271_vm0, %v1270_v0  ;;  %949 = vmatpush3.bf16.msra.mxu1 %v1064_v53 }
 0x1ff   : > { %v511_v43 = vpack.c.bf16 %v509_v42, %v508_v41  ;;  %950 = vmatprep.subr.bf16.mxu1 %v1270_v0 }
 0x201   : > { %642 = vrot.lane.b32.xlu1 %v511_v43, %s1274_s26 }
 0x202   : > { %951 = vmatpush3.bf16.msra.mxu1 %v1065_v54 }
 0x203   : > { %964 = vmatprep.subr.bf16.mxu1 %v1270_v0 }
 0x26b   : > { %v641_v44 = vpop.permute.xlu1 %640 }
 0x26c   : > { %957 = vmatpush3.bf16.msra.mxu0 %v641_v44 }
 0x26d   : > { %958 = vmatprep.subr.bf16.mxu0 %v1270_v0 }
 0x273   : > { %v643_v45 = vpop.permute.xlu1 %642 }
 0x274   : > { %959 = vmatpush3.bf16.msra.mxu0 %v643_v45 }
 0x2d0   : > { %v563_v47 = vpop.f32.mrb[0].mxu1 }
 0x2d1   : > { %v564_v48 = vadd.f32 %v563_v47, %v512_v46  ;;  %v946_v49 = vpop.f32.mrb[1].mxu1 }
 0x2d2   : > { %v566_v50 = vpop.f32.mrb[2].mxu1 }
 0x2d3   : > { %v947_v51 = vpop.f32.mrb[3].mxu1  ;;  %v569_v52 = vsel %vm519_vm2, %v564_v48, -inf }
 0x2d4   : > { %570 = vmax.xlane.f32.xlu0 %v569_v52 }
 0x361   : > { %v571_v55 = vpop.xlane.xlu0 %570 }
 0x362   : > { %v572_v56 = vsub.f32 %v564_v48, %v571_v55 }
 0x364   : > { %v573_v57 = vmul.f32 1.442695, %v572_v56 }
 0x366   : > { %1068 = vpow2.f32 %v573_v57 }
 0x370   : > { %v1069_v58 = vpop.eup %1068 }
 0x371   : > { %v575_v59 = vpack.c.bf16 %v1069_v58, %v1069_v58 }
 0x373   : > { %953 = vmatmul.mubr.msk.bf16.vlgmr.msra.gmra.mrb[4].mxu1 %vm519_vm2, %v575_v59 }
 0x374   : > { %968 = vmatprep.mubr.msk.bf16.mxu1 %vm1271_vm0, %v1270_v0  ;;  %965 = vmatpush3.bf16.msra.mxu1 %v1066_v60 }
 0x375   : > { %966 = vmatprep.subr.bf16.mxu1 %v1270_v0 }
 0x378   : > { %967 = vmatpush3.bf16.msra.mxu1 %v1067_v61 }
 0x446   : > { %v629_v62 = vpop.f32.mrb[4].mxu1 }
 0x447   : > { %v630_v63 = vadd.f32 1e-30, %v629_v62  ;;  %v954_v1 = vpop.f32.mrb[5].mxu1 }
 0x448   : > { %v632_v2 = vpop.f32.mrb[6].mxu1 }
 0x449   : > { %1070 = vrcp.f32 %v630_v63  ;;  %v955_v3 = vpop.f32.mrb[7].mxu1 }
 0x453   : > { %v1071_v4 = vpop.eup %1070 }
 0x454   : > { %v636_v5 = vmul.f32 %v1071_v4, %v1069_v58 }
 0x456   : > { %v637_v6 = vpack.c.bf16 %v636_v5, %v636_v5 }
 0x458   : > { %961 = vmatmul.mubr.msk.bf16.vlgmr.msra.gmra.mrb[4].mxu0 %vm519_vm2, %v637_v6 }
 0x52b   : > { %v683_v7 = vpop.f32.mrb[4].mxu0 }
 0x52c   : > { %v689_v8 = vpack.c.bf16 %v683_v7, %v683_v7  ;;  %v962_v9 = vpop.f32.mrb[5].mxu0 }
 0x52d   : > { %v686_v10 = vpop.f32.mrb[6].mxu0 }
 0x52e   : > { %v963_v0 = vpop.f32.mrb[7].mxu0  ;;  %969 = vmatmul.mubr.msk.bf16.vlgmr.msra.gmra.mrb[8].mxu1 %vm519_vm2, %v689_v8 }
 0x601   : > { %v750_v12 = vpop.f32.mrb[8].mxu1 }
 0x602   : > { %v751_v13 = vadd.f32 %v897_v11, %v750_v12  ;;  %v970_v14 = vpop.f32.mrb[9].mxu1 }
 0x603   : > { %v753_v15 = vpop.f32.mrb[10].mxu1 }
 0x604   : > { %v971_v16 = vpop.f32.mrb[11].mxu1  ;;  %756 = vst.msk [vmem:[%s364_s13] sm:$0xff] %vm519_vm2, %v751_v13 }
 0x605   : > { %1199 = shalt.err (!%p1196_p4)
}
 0x606   : > { %s1200_s21 = scalar_lea.hbm %s1584_s19, 128  ;;  %s1204_s25 = scalar_lea.hbm %s1637_s8, 256 }
 0x607   : > { %p1201_p0 = scmp.ne.s32.totalorder %s1584_s19, %s1200_s21  ;;  %p1205_p8 = scmp.lt.u32.totalorder %s1584_s19, %s1637_s8 }
 0x608   : > { %p1206_p13 = scmp.lt.u32.totalorder %s1204_s25, %s1200_s21  ;;  %p1208_p10 = scmp.lt.u32.totalorder %s1200_s21, %s1584_s19 }
 0x609   : > { %p1202_p9 = pnand %p1201_p0, %p1466_p5 }
 0x60a   : > { %p1207_p6 = por %p1206_p13, %p1205_p8 }
 0x60b   : > { %p1203_p11 = pneg %p1202_p9 }
 0x60c   : > { %p1209_p3 = por %p1208_p10, %p1207_p6 }
 0x60e   : > { %p1210_p7 = pnand %p1209_p3, %p1203_p11 }
 0x610   : > { %1213 = shalt.err (!%p1210_p7)
}
 0x611   : > { %986 = dma.vmem_to_hbm [thread:$0]  (%p1466_p5), %s1586_s17, 128, %s1584_s19, %s758_s9  }
 0x612 PF: > { %s1659_s13 = sld [smem:[#allocation15_spill]]  ;;  %s1660_s18 = sld [smem:[#allocation16_spill]] }
 0x613   : > { %p1662_p2 = scmp.ge.s32.totalorder %s1260_s30, 2 }
 0x618   : > { %s783_s26 = sand.u32 1, %s1659_s13   ;;  %p1661_p12 = scmp.ne.s32.totalorder %s1660_s18, 0 }
 0x619   : > { %s784_s22 = scalar_lea.sflag [#allocation4], %s783_s26 }
 0x61a   : > { %p1003_p1 = pnand %p1662_p2, %p1661_p12 }
 0x61c   : > { %1243 = dma.done.wait (!%p1003_p1), %s784_s22, 128  }
 0x61d   : > { %1245 = vsyncadd (!%p1003_p1), %s784_s22, 4294967168  ;;  %s1663_s10 = smov %s1452_s27  ;;  %p23_p4 = scmp.ge.s32.totalorder %s1452_s27, 4  }
 0x61e   : > { %s1664_s27 = smov %s1252_s28  ;;  %s1665_s28 = smov %s1256_s29 }
 0x61f   : > { %s1666_s29 = smov %s1462_s23  ;;  %s1667_s30 = smov %s1663_s10 }
 0x620   :  { %25 = sbr.rel (!%p23_p4) target bundleno = 7 (0x7), region = 109 }
 0x627   :  { %789 = vsyncpa [#allocation3], 1 }
 0x628   :  { %791 = vsyncpa [#allocation3 + $0x1], 1 }
 0x629   :  { %792 = vsyncpa [#allocation6], 1 }
 0x62a   :  { %793 = vsyncpa [#allocation9], 1 }
 0x62b   :  { %794 = vsyncpa [#allocation4], 1 }
 0x62c   :  { %796 = vsyncpa [#allocation4 + $0x1], 1 }

</bundles_post_ra>
